<compile_context>
chip_gen: v6e
topology: v6e:2x2x1
jax: 0.10.0
libtpu: 0.0.40
codegen_flags: <defaults>
</compile_context>

<pallas_src>
import math

import jax
import jax.numpy as jnp
from jax.experimental import pallas as pl
from jax.experimental.pallas import tpu as pltpu

D_MODEL = 512
EPS = 1e-6  # module explicitly sets eps=1e-06 (not nn.LayerNorm's default 1e-5)
_INV_D = 1.0 / D_MODEL

# VMEM working-set budget used to size the row tile (double-buffered in+out tiles
# plus the f32 intermediates the kernel materializes).  40 MiB keeps the kernel
# comfortably inside v7x's 64 MiB physical VMEM and well inside v5e/v6e's 128 MiB.
_TILE_WS_BUDGET = 40 << 20
_VMEM_LIMIT_CAP = 56 << 20


def layernorm_kernel(x_ref, g_ref, b_ref, o_ref):
    # x_ref: (TILE_ROWS, D_MODEL); g_ref/b_ref: (1, D_MODEL), already float32.
    x = x_ref[...].astype(jnp.float32)
    # Biased (divide-by-N) statistics, matching torch.nn.LayerNorm; constant 1/D
    # multiplies instead of divides; numerically robust centered variance.
    mean = jnp.sum(x, axis=-1, keepdims=True) * jnp.float32(_INV_D)
    centered = x - mean
    var = jnp.sum(centered * centered, axis=-1, keepdims=True) * jnp.float32(_INV_D)
    inv = jax.lax.rsqrt(var + jnp.float32(EPS))
    o_ref[...] = (centered * inv * g_ref[...] + b_ref[...]).astype(o_ref.dtype)


def _round_up16(n):
    return ((int(n) + 15) // 16) * 16


def _choose_tile_rows(rows, in_itemsize, out_itemsize, n_f32_tmp, requested=None):
    """Pick the row-tile size.

    Strategy (per perf review):
      * tiles as large as the VMEM working-set budget allows (f32 -> 4096 rows),
      * for large inputs target >= ~8 blocks so the DMA pipeline fills and (on
        v7x) both TensorCores get several blocks each,
      * no artificial 2-way split for mid-size inputs (buys nothing on 1-TC
        v5e/v6e, just adds grid-step overhead),
      * prefer an even block count (balances the v7x megacore split; harmless
        on single-TC chips),
      * single-block case uses tile == rows (block dim == full array dim is
        always layout-legal, no masking needed).
    """
    per_row_ws = D_MODEL * (2 * in_itemsize + 2 * out_itemsize + n_f32_tmp * 4)
    max_tile = max(16, (_TILE_WS_BUDGET // per_row_ws) // 16 * 16)

    if requested is not None:
        tile = _round_up16(requested)
    elif rows > 8 * max_tile:
        tile = max_tile                        # huge input: biggest tiles, plenty of blocks
    elif rows >= 8 * 256:
        tile = _round_up16(pl.cdiv(rows, 8))   # mid/large: ~8 blocks, tiles still big
    else:
        tile = rows                            # small input: one block is cheapest

    tile = min(tile, max_tile)
    if tile >= rows:
        return rows                            # single full-array block
    tile = max(16, _round_up16(tile))          # f32 (8,128) and bf16 (16,128) friendly

    # Prefer an even number of blocks (v7x two-TensorCore balance).
    nb = pl.cdiv(rows, tile)
    if nb > 1 and nb % 2 == 1:
        alt = max(16, _round_up16(pl.cdiv(rows, nb + 1)))
        if alt <= max_tile and pl.cdiv(rows, alt) % 2 == 0:
            tile = alt
    return tile


def layer_norm(x, gamma, beta, *, tile_rows=None):
    """LayerNorm over the last axis (= D_MODEL). x: (..., D_MODEL); gamma/beta: (D_MODEL,)."""
    orig_shape = x.shape
    assert orig_shape[-1] == D_MODEL, "last dim must be d_model"
    rows = math.prod(orig_shape[:-1]) if len(orig_shape) > 1 else 1
    x2d = x.reshape(rows, D_MODEL)

    # Affine params cast to f32 once in the wrapper (tiny arrays).
    g2d = gamma.astype(jnp.float32).reshape(1, D_MODEL)
    b2d = beta.astype(jnp.float32).reshape(1, D_MODEL)

    in_isz = jnp.dtype(x.dtype).itemsize
    out_isz = in_isz
    n_f32_tmp = 1 if x.dtype == jnp.float32 else 2  # (x cast to f32 if needed) + centered

    tile = _choose_tile_rows(rows, in_isz, out_isz, n_f32_tmp, tile_rows)
    num_blocks = pl.cdiv(rows, tile)

    # Need-based scoped-VMEM limit: double-buffered in/out tiles + f32 temporaries
    # + headroom.  Explicit so the big-tile strategy is legal on v5e's 16 MiB
    # scoped default and doesn't over-reserve on v7x (64 MiB physical).
    ws = tile * D_MODEL * (2 * in_isz + 2 * out_isz + n_f32_tmp * 4)
    vmem_limit_bytes = int(min(max(ws + (8 << 20), 16 << 20), _VMEM_LIMIT_CAP))

    out = pl.pallas_call(
        layernorm_kernel,
        out_shape=jax.ShapeDtypeStruct((rows, D_MODEL), x.dtype),
        grid_spec=pltpu.PrefetchScalarGridSpec(
            num_scalar_prefetch=0,
            grid=(num_blocks,),
            in_specs=[
                pl.BlockSpec((tile, D_MODEL), lambda i: (i, 0)),
                pl.BlockSpec((1, D_MODEL), lambda i: (0, 0)),
                pl.BlockSpec((1, D_MODEL), lambda i: (0, 0)),
            ],
            out_specs=pl.BlockSpec((tile, D_MODEL), lambda i: (i, 0)),
        ),
        compiler_params=pltpu.CompilerParams(
            dimension_semantics=("parallel",),   # row axis shards across v7x's 2 TCs
            vmem_limit_bytes=vmem_limit_bytes,
        ),
    )(x2d, g2d, b2d)

    return out.reshape(orig_shape)


if __name__ == "__main__":
    key = jax.random.PRNGKey(0)
    kx, kg, kb, kx2, kx3 = jax.random.split(key, 5)

    def ref_ln(inp, g, b):
        mean = jnp.mean(inp, axis=-1, keepdims=True)
        var = jnp.mean((inp - mean) ** 2, axis=-1, keepdims=True)
        return (inp - mean) / jnp.sqrt(var + EPS) * g + b

    # nn.LayerNorm defaults are weight=1, bias=0; perturb deterministically so the
    # affine path is exercised.
    gamma = jnp.ones((D_MODEL,), jnp.float32) + 0.01 * jax.random.normal(kg, (D_MODEL,), jnp.float32)
    beta = 0.01 * jax.random.normal(kb, (D_MODEL,), jnp.float32)

    # Small shape consistent with the module: (batch=2, seq=8, d_model=512).
    x = jax.random.normal(kx, (2, 8, D_MODEL), dtype=jnp.float32)
    y = jax.block_until_ready(layer_norm(x, gamma, beta))
    assert jnp.allclose(y, ref_ln(x, gamma, beta), atol=1e-5, rtol=1e-5), "mismatch vs reference"

    # Ragged single-block path: rows=15 (block == full array dim, no masking).
    x2 = jax.random.normal(kx2, (3, 5, D_MODEL), dtype=jnp.float32)
    y2 = jax.block_until_ready(layer_norm(x2, gamma, beta))
    assert jnp.allclose(y2, ref_ln(x2, gamma, beta), atol=1e-5, rtol=1e-5), "mismatch (ragged, 1 block)"

    # Ragged multi-block path: rows=40 with 16-row tiles -> masked partial last block,
    # no wrapper-side pad/slice copies.
    x3 = jax.random.normal(kx3, (5, 8, D_MODEL), dtype=jnp.float32)
    y3 = jax.block_until_ready(layer_norm(x3, gamma, beta, tile_rows=16))
    assert jnp.allclose(y3, ref_ln(x3, gamma, beta), atol=1e-5, rtol=1e-5), "mismatch (ragged, multi-block)"

    print("KERNEL_OK")
</pallas_src>

<mosaic_0001>
module attributes {stable_mosaic.version = 11 : i64} {
  func.func @layernorm_kernel(%arg0: i32, %arg1: memref<16x512xf32, #tpu.memory_space<vmem>>, %arg2: memref<1x512xf32, #tpu.memory_space<vmem>>, %arg3: memref<1x512xf32, #tpu.memory_space<vmem>>, %arg4: memref<16x512xf32, #tpu.memory_space<vmem>>) attributes {dimension_semantics = [#tpu.dimension_semantics<parallel>], iteration_bounds = array<i64: 1>, scalar_prefetch = 0 : i64, scratch_operands = 0 : i64, tpu.core_type = #tpu.core_type<tc>, window_params = [{transform_indices = @transform_0, window_bounds = array<i64: 16, 512>}, {pipeline_mode = #tpu.pipeline_mode<synchronous>, transform_indices = @transform_1, window_bounds = array<i64: 1, 512>}, {pipeline_mode = #tpu.pipeline_mode<synchronous>, transform_indices = @transform_2, window_bounds = array<i64: 1, 512>}, {transform_indices = @transform_3, window_bounds = array<i64: 16, 512>}]} {
    %c0 = arith.constant 0 : index
    %c0_0 = arith.constant 0 : index
    %0 = vector.load %arg1[%c0, %c0_0] : memref<16x512xf32, #tpu.memory_space<vmem>>, vector<16x512xf32>
    %cst = arith.constant dense<0.000000e+00> : vector<16xf32>
    %1 = vector.multi_reduction <add>, %0, %cst [1] : vector<16x512xf32> to vector<16xf32>
    %2 = vector.shape_cast %1 : vector<16xf32> to vector<16x1xf32>
    %cst_1 = arith.constant 0.001953125 : f32
    %3 = vector.broadcast %cst_1 : f32 to vector<16x1xf32>
    %4 = arith.mulf %2, %3 : vector<16x1xf32>
    %5 = vector.broadcast %4 : vector<16x1xf32> to vector<16x512xf32>
    %6 = arith.subf %0, %5 : vector<16x512xf32>
    %7 = arith.mulf %6, %6 : vector<16x512xf32>
    %cst_2 = arith.constant dense<0.000000e+00> : vector<16xf32>
    %8 = vector.multi_reduction <add>, %7, %cst_2 [1] : vector<16x512xf32> to vector<16xf32>
    %9 = vector.shape_cast %8 : vector<16xf32> to vector<16x1xf32>
    %cst_3 = arith.constant 0.001953125 : f32
    %10 = vector.broadcast %cst_3 : f32 to vector<16x1xf32>
    %11 = arith.mulf %9, %10 : vector<16x1xf32>
    %cst_4 = arith.constant 9.99999997E-7 : f32
    %12 = vector.broadcast %cst_4 : f32 to vector<16x1xf32>
    %13 = arith.addf %11, %12 : vector<16x1xf32>
    %14 = math.rsqrt %13 : vector<16x1xf32>
    %15 = vector.broadcast %14 : vector<16x1xf32> to vector<16x512xf32>
    %16 = arith.mulf %6, %15 : vector<16x512xf32>
    %c0_5 = arith.constant 0 : index
    %c0_6 = arith.constant 0 : index
    %17 = vector.load %arg2[%c0_5, %c0_6] : memref<1x512xf32, #tpu.memory_space<vmem>>, vector<1x512xf32>
    %18 = vector.broadcast %17 : vector<1x512xf32> to vector<16x512xf32>
    %19 = arith.mulf %16, %18 : vector<16x512xf32>
    %c0_7 = arith.constant 0 : index
    %c0_8 = arith.constant 0 : index
    %20 = vector.load %arg3[%c0_7, %c0_8] : memref<1x512xf32, #tpu.memory_space<vmem>>, vector<1x512xf32>
    %21 = vector.broadcast %20 : vector<1x512xf32> to vector<16x512xf32>
    %22 = arith.addf %19, %21 : vector<16x512xf32>
    %c0_9 = arith.constant 0 : index
    %c0_10 = arith.constant 0 : index
    %23 = vector.load %arg4[%c0_9, %c0_10] : memref<16x512xf32, #tpu.memory_space<vmem>>, vector<16x512xf32>
    tpu.vector_store %arg4[%c0_9, %c0_10], %22 {strides = array<i32>} : memref<16x512xf32, #tpu.memory_space<vmem>>, vector<16x512xf32>,
    return
  }
  func.func @transform_0(%arg0: i32) -> (i32, i32) {
    %c0_i32 = arith.constant 0 : i32
    %c0_i32_0 = arith.constant 0 : i32
    return %arg0, %c0_i32 : i32, i32
  }
  func.func @transform_1(%arg0: i32) -> (i32, i32) {
    %c0_i32 = arith.constant 0 : i32
    %c0_i32_0 = arith.constant 0 : i32
    %c0_i32_1 = arith.constant 0 : i32
    return %c0_i32, %c0_i32_0 : i32, i32
  }
  func.func @transform_2(%arg0: i32) -> (i32, i32) {
    %c0_i32 = arith.constant 0 : i32
    %c0_i32_0 = arith.constant 0 : i32
    %c0_i32_1 = arith.constant 0 : i32
    return %c0_i32, %c0_i32_0 : i32, i32
  }
  func.func @transform_3(%arg0: i32) -> (i32, i32) {
    %c0_i32 = arith.constant 0 : i32
    %c0_i32_0 = arith.constant 0 : i32
    return %arg0, %c0_i32 : i32, i32
  }
}

</mosaic_0001>

<bundles_post_ra>
// kernel: tpu_custom_call.1
= control target key start
LH: loop header
LB: loop body
LE: loop exit
PB: predicated region body
PF: predicated region fallthrough
CT: control target
= control target key end

     0   :  { %8 = vsyncpa [#allocation3], 0  ;;  %s338_s0 = inlined_call_operand.hbm [shape: f32[16,512], index: 0, kind: input, shape index: {}]   ;;  %s339_s1 = inlined_call_operand.hbm [shape: f32[1,512], index: 1, kind: input, shape index: {}]   ;;  %s340_s2 = inlined_call_operand.hbm [shape: f32[1,512], index: 2, kind: input, shape index: {}]   ;;  %s341_s3 = inlined_call_operand.hbm [shape: f32[16,512], index: 3, kind: output, shape index: {}]  }
   0x1   :  { %9 = vsyncpa [#allocation6], 0 }
   0x2   :  { %10 = vsyncpa [#allocation4], 0  ;;  %s294_s12 = smov [#allocation5]   ;;  %s295_s14 = smov [#allocation2]  }
   0x3   :  { %s29_s13 = sshll.u32 %s294_s12, 4  ;;  %s16_s15 = sshll.u32 %s295_s14, 4  ;;  %s30_s13 = int_to_ptr.vmem [resolvable:$true] %s29_s13  ;;  %s17_s15 = int_to_ptr.vmem [resolvable:$true] %s16_s15 }
   0x4   :  { %s216_s16 = scalar_lea.vmem %s30_s13, 64  ;;  %p221_p1 = scmp.lt.s32.totalorder %s30_s13, %s30_s13 }
   0x5   :  { %p217_p0 = scmp.ne.s32.totalorder %s30_s13, %s216_s16  ;;  %p222_p2 = scmp.lt.s32.totalorder %s216_s16, %s216_s16 }
   0x7   :  { %p223_p3 = por %p222_p2, %p221_p1 }
   0x9   :  { %p224_p4 = pnand %p223_p3, %p217_p0 }
   0xb   :  { %227 = shalt.err (!%p224_p4)
}
   0xc   :  { %32 = dma.hbm_to_vmem [thread:$0]  %s339_s1, 64, %s30_s13, [#allocation6]  }
   0xd   :  { %s236_s19 = scalar_lea.vmem %s17_s15, 1024  ;;  %p241_p6 = scmp.lt.s32.totalorder %s17_s15, %s17_s15 }
   0xe   :  { %p237_p5 = scmp.ne.s32.totalorder %s17_s15, %s236_s19  ;;  %p242_p7 = scmp.lt.s32.totalorder %s236_s19, %s236_s19 }
  0x10   :  { %p243_p8 = por %p242_p7, %p241_p6 }
  0x12   :  { %p244_p9 = pnand %p243_p8, %p237_p5 }
  0x14   :  { %247 = shalt.err (!%p244_p9)
}
  0x15   :  { %s296_s20 = smov 512   ;;  %s297_s21 = smov 32  }
  0x16   :  { %22 = dma.hbm_to_vmem [thread:$0]  %s338_s0, 1024, %s17_s15, [#allocation3], %s296_s20, %s296_s20, %s297_s21  }
  0x17   :  { %s298_s24 = smov [#allocation7]  }
  0x18   :  { %s39_s25 = sshll.u32 %s298_s24, 4  ;;  %s40_s25 = int_to_ptr.vmem [resolvable:$true] %s39_s25 }
  0x19   :  { %s256_s1 = scalar_lea.vmem %s40_s25, 64  ;;  %p261_p11 = scmp.lt.s32.totalorder %s40_s25, %s40_s25 }
  0x1a   :  { %p257_p10 = scmp.ne.s32.totalorder %s40_s25, %s256_s1  ;;  %p262_p12 = scmp.lt.s32.totalorder %s256_s1, %s256_s1 }
  0x1c   :  { %p263_p13 = por %p262_p12, %p261_p11 }
  0x1e   :  { %p264_p0 = pnand %p263_p13, %p257_p10 }
  0x20   :  { %267 = shalt.err (!%p264_p0)
}
  0x21   :  { %42 = dma.hbm_to_vmem [thread:$0]  %s340_s2, 64, %s40_s25, [#allocation6]  }
  0x22   :  { %288 = dma.done.wait [#allocation3], 1024  }
  0x23   :  { %289 = vsyncadd [#allocation3], 4294966272 }
  0x24   :  { %290 = dma.done.wait [#allocation6], 128  }
  0x25   :  { %291 = vsyncadd [#allocation6], 4294967168  ;;  %v52_v0 = vld [vmem:[#allocation2] sm:$0xff]  ;;  %v53_v1 = vld [vmem:[#allocation2 + $0x8] sm:$0xff]  ;;  %v114_v45 = vlaneseq  ;;  %s299_s0 = smov [#allocation8]  }
  0x26   :  { %v54_v2 = vld [vmem:[#allocation2 + $0x10] sm:$0xff]  ;;  %v60_v3 = vadd.f32 %v53_v1, %v52_v0  ;;  %v56_v4 = vld [vmem:[#allocation2 + $0x20] sm:$0xff]  ;;  %v57_v5 = vld [vmem:[#allocation2 + $0x28] sm:$0xff]  ;;  %s185_s2 = sshll.u32 %s299_s0, 4  ;;  %s186_s2 = int_to_ptr.vmem [resolvable:$true] %s185_s2 }
  0x27   :  { %v55_v6 = vld [vmem:[#allocation2 + $0x18] sm:$0xff]  ;;  %v58_v7 = vld [vmem:[#allocation2 + $0x30] sm:$0xff]  ;;  %v65_v8 = vadd.f32 %v57_v5, %v56_v4  ;;  %v115_v47 = vshrl.u32 %v114_v45, 7  ;;  %v112_v52 = vld [vmem:[#allocation5] sm:$0xf]  ;;  %s268_s28 = scalar_lea.vmem %s186_s2, 1024  ;;  %p273_p2 = scmp.lt.s32.totalorder %s186_s2, %s186_s2 }
  0x28   :  { %v61_v9 = vadd.f32 %v60_v3, %v54_v2  ;;  %v59_v10 = vld [vmem:[#allocation2 + $0x38] sm:$0xff]  ;;  %v142_v57 = vld [vmem:[#allocation7] sm:$0xf]  ;;  %p269_p1 = scmp.ne.s32.totalorder %s186_s2, %s268_s28  ;;  %p274_p3 = scmp.lt.s32.totalorder %s268_s28, %s268_s28 }
  0x29   :  { %v66_v11 = vadd.f32 %v65_v8, %v58_v7  ;;  %v116_v48 = vsub.s32 0, %v115_v47  ;;  %v120_v49 = vsub.s32 1, %v115_v47  ;;  %v124_v50 = vsub.s32 2, %v115_v47 }
  0x2a   :  { %v62_v12 = vadd.f32 %v61_v9, %v55_v6  ;;  %v128_v51 = vsub.s32 3, %v115_v47  ;;  %p275_p4 = por %p274_p3, %p273_p2 }
  0x2b   :  { %v67_v13 = vadd.f32 %v66_v11, %v59_v10  ;;  %v117_v53 = vrot.slane %v112_v52, %v116_v48  ;;  %v121_v54 = vrot.slane %v112_v52, %v120_v49  ;;  %v125_v55 = vrot.slane %v112_v52, %v124_v50 }
  0x2c   :  { %63 = vadd.xlane.f32.xlu0 %v62_v12  ;;  %v129_v56 = vrot.slane %v112_v52, %v128_v51  ;;  %v147_v63 = vrot.slane %v142_v57, %v116_v48  ;;  %p276_p5 = pnand %p275_p4, %p269_p1 }
  0x30   :  { %68 = vadd.xlane.f32.xlu0 %v67_v13 }
  0xb5   :  { %v64_v14 = vpop.xlane.xlu0 %63 }
  0xb6   :  { %v70_v15 = vmul.f32 0.001953125, %v64_v14 }
  0xb8   :  { %v72_v16 = vsub.f32 %v52_v0, %v70_v15  ;;  %v73_v17 = vsub.f32 %v53_v1, %v70_v15  ;;  %v74_v18 = vsub.f32 %v54_v2, %v70_v15  ;;  %v75_v20 = vsub.f32 %v55_v6, %v70_v15 }
  0xb9   :  { %v69_v19 = vpop.xlane.xlu0 %68  ;;  %v151_v0 = vrot.slane %v142_v57, %v120_v49  ;;  %v155_v1 = vrot.slane %v142_v57, %v124_v50  ;;  %v159_v2 = vrot.slane %v142_v57, %v128_v51 }
  0xba   :  { %v71_v21 = vmul.f32 0.001953125, %v69_v19  ;;  %v80_v22 = vmul.f32 %v72_v16, %v72_v16  ;;  %v81_v23 = vmul.f32 %v73_v17, %v73_v17  ;;  %v82_v24 = vmul.f32 %v74_v18, %v74_v18 }
  0xbb   :  { %v83_v29 = vmul.f32 %v75_v20, %v75_v20 }
  0xbc   :  { %v76_v25 = vsub.f32 %v56_v4, %v71_v21  ;;  %v77_v26 = vsub.f32 %v57_v5, %v71_v21  ;;  %v88_v27 = vadd.f32 %v81_v23, %v80_v22  ;;  %v78_v28 = vsub.f32 %v58_v7, %v71_v21 }
  0xbd   :  { %v79_v31 = vsub.f32 %v59_v10, %v71_v21 }
  0xbe   :  { %v89_v30 = vadd.f32 %v88_v27, %v82_v24  ;;  %v84_v32 = vmul.f32 %v76_v25, %v76_v25  ;;  %v85_v33 = vmul.f32 %v77_v26, %v77_v26  ;;  %v86_v35 = vmul.f32 %v78_v28, %v78_v28 }
  0xbf   :  { %v87_v37 = vmul.f32 %v79_v31, %v79_v31 }
  0xc0   :  { %v90_v34 = vadd.f32 %v89_v30, %v83_v29  ;;  %v93_v36 = vadd.f32 %v85_v33, %v84_v32 }
  0xc2   :  { %91 = vadd.xlane.f32.xlu1 %v90_v34  ;;  %v94_v38 = vadd.f32 %v93_v36, %v86_v35 }
  0xc4   :  { %v95_v39 = vadd.f32 %v94_v38, %v87_v37 }
  0xc6   :  { %96 = vadd.xlane.f32.xlu1 %v95_v39 }
 0x14b   :  { %v92_v40 = vpop.xlane.xlu1 %91 }
 0x14c   :  { %v98_v41 = vmul.f32 0.001953125, %v92_v40 }
 0x14e   :  { %v100_v42 = vadd.f32 1e-06, %v98_v41 }
 0x14f   :  { %v97_v43 = vpop.xlane.xlu1 %96 }
 0x150   :  { %204 = vrsqrt.f32 %v100_v42  ;;  %v99_v44 = vmul.f32 0.001953125, %v97_v43 }
 0x152   :  { %v101_v46 = vadd.f32 1e-06, %v99_v44 }
 0x154   :  { %206 = vrsqrt.f32 %v101_v46 }
 0x15d   :  { %v205_v58 = vpop.eup %204 }
 0x15e   :  { %v104_v59 = vmul.f32 %v205_v58, %v72_v16  ;;  %v105_v60 = vmul.f32 %v205_v58, %v73_v17  ;;  %v106_v61 = vmul.f32 %v205_v58, %v74_v18  ;;  %v107_v62 = vmul.f32 %v205_v58, %v75_v20 }
 0x160   :  { %v134_v3 = vmul.f32 %v117_v53, %v104_v59  ;;  %v135_v4 = vmul.f32 %v121_v54, %v105_v60  ;;  %v136_v5 = vmul.f32 %v125_v55, %v106_v61  ;;  %v137_v6 = vmul.f32 %v129_v56, %v107_v62 }
 0x161   :  { %v207_v7 = vpop.eup %206 }
 0x162   :  { %v108_v8 = vmul.f32 %v207_v7, %v76_v25  ;;  %v109_v9 = vmul.f32 %v207_v7, %v77_v26  ;;  %v110_v10 = vmul.f32 %v207_v7, %v78_v28  ;;  %v111_v11 = vmul.f32 %v207_v7, %v79_v31 }
 0x163   :  { %v164_v12 = vadd.f32 %v147_v63, %v134_v3  ;;  %v165_v13 = vadd.f32 %v151_v0, %v135_v4  ;;  %v166_v14 = vadd.f32 %v155_v1, %v136_v5  ;;  %v167_v15 = vadd.f32 %v159_v2, %v137_v6 }
 0x164   :  { %v138_v16 = vmul.f32 %v117_v53, %v108_v8  ;;  %v139_v17 = vmul.f32 %v121_v54, %v109_v9  ;;  %v140_v18 = vmul.f32 %v125_v55, %v110_v10  ;;  %v141_v19 = vmul.f32 %v129_v56, %v111_v11 }
 0x165   :  { %172 = vst [vmem:[#allocation8] sm:$0xff] %v164_v12  ;;  %173 = vst [vmem:[#allocation8 + $0x8] sm:$0xff] %v165_v13 }
 0x166   :  { %174 = vst [vmem:[#allocation8 + $0x10] sm:$0xff] %v166_v14  ;;  %175 = vst [vmem:[#allocation8 + $0x18] sm:$0xff] %v167_v15  ;;  %v168_v20 = vadd.f32 %v147_v63, %v138_v16  ;;  %v169_v21 = vadd.f32 %v151_v0, %v139_v17  ;;  %v170_v22 = vadd.f32 %v155_v1, %v140_v18 }
 0x167   :  { %v171_v23 = vadd.f32 %v159_v2, %v141_v19 }
 0x168   :  { %176 = vst [vmem:[#allocation8 + $0x20] sm:$0xff] %v168_v20  ;;  %177 = vst [vmem:[#allocation8 + $0x28] sm:$0xff] %v169_v21 }
 0x169   :  { %178 = vst [vmem:[#allocation8 + $0x30] sm:$0xff] %v170_v22  ;;  %179 = vst [vmem:[#allocation8 + $0x38] sm:$0xff] %v171_v23 }
 0x16a   :  { %279 = shalt.err (!%p276_p5)
}
 0x16b   :  { %191 = dma.vmem_to_hbm [thread:$0]  %s186_s2, 1024, %s341_s3, [#allocation4], %s296_s20, %s296_s20, %s297_s21  }
 0x16c   :  { %292 = dma.done.wait [#allocation4], 1024  }
 0x16d   :  { %293 = vsyncadd [#allocation4], 4294966272 }
 0x16e   :  { %195 = vsyncpa [#allocation3], 1 }
 0x16f   :  { %196 = vsyncpa [#allocation6], 1 }
 0x170   :  { %197 = vsyncpa [#allocation4], 1 }

</bundles_post_ra>
